<compile_context>
chip_gen: v7x
topology: tpu7x:2x2x1
jax: 0.10.0
libtpu: 0.0.40
codegen_flags: <defaults>
</compile_context>

<pallas_src>
import functools

import jax
import jax.numpy as jnp
from jax.experimental import pallas as pl
from jax.experimental.pallas import tpu as pltpu

D_IN = 784          # 1*28*28, flattened exactly like torch .view(B, -1)
H1, H2, D_OUT = 5, 9, 10
H1P, H2P, OUTP = 128, 128, 128   # lane-aligned padded widths


def _round_up(n, m):
    return (n + m - 1) // m * m


def mlp_kernel(x_ref, w1_ref, b1_ref, w2_ref, b2_ref, w3_ref, b3_ref, o_ref):
    # x_ref: (TB, 784) bf16 ; w1: (784,128) bf16 ; w2/w3: (128,128) bf16
    # biases: (1, 128) f32 (zero in padded columns).
    x = x_ref[...]

    h1 = jnp.dot(x, w1_ref[...], preferred_element_type=jnp.float32) + b1_ref[...]
    h1 = jnp.maximum(h1, 0.0).astype(jnp.bfloat16)

    h2 = jnp.dot(h1, w2_ref[...], preferred_element_type=jnp.float32) + b2_ref[...]
    h2 = jnp.maximum(h2, 0.0).astype(jnp.bfloat16)

    out = jnp.dot(h2, w3_ref[...], preferred_element_type=jnp.float32) + b3_ref[...]
    o_ref[...] = out.astype(o_ref.dtype)   # (TB, 128) lane-dense unmasked store


def init_params(key):
    # Mimics nn.Linear init: uniform(-1/sqrt(fan_in), 1/sqrt(fan_in)); stored as [in, out].
    def linear(key, fan_in, fan_out):
        kw, kb = jax.random.split(key)
        bound = 1.0 / jnp.sqrt(fan_in)
        w = jax.random.uniform(kw, (fan_in, fan_out), jnp.float32, -bound, bound)
        b = jax.random.uniform(kb, (fan_out,), jnp.float32, -bound, bound)
        return w, b

    k1, k2, k3 = jax.random.split(key, 3)
    w1, b1 = linear(k1, D_IN, H1)
    w2, b2 = linear(k2, H1, H2)
    w3, b3 = linear(k3, H2, D_OUT)
    return (w1, b1, w2, b2, w3, b3)


def prepare_params(params):
    """One-time host-side prep: zero-pad to 128-lane widths, cast weights to bf16."""
    w1, b1, w2, b2, w3, b3 = params

    def pad_w(w, rows, cols):
        wp = jnp.zeros((rows, cols), jnp.float32).at[: w.shape[0], : w.shape[1]].set(w)
        return wp.astype(jnp.bfloat16)

    def pad_b(b, cols):
        return jnp.zeros((1, cols), jnp.float32).at[0, : b.shape[0]].set(b)

    w1p = pad_w(w1, D_IN, H1P)
    w2p = pad_w(w2, H1P, H2P)
    w3p = pad_w(w3, H2P, OUTP)
    return (w1p, pad_b(b1, H1P), w2p, pad_b(b2, H2P), w3p, pad_b(b3, OUTP))


@functools.partial(jax.jit, static_argnames=("tb",))
def model_2_forward(x_nchw, prepared, tb=512):
    w1p, b1p, w2p, b2p, w3p, b3p = prepared
    B = x_nchw.shape[0]
    x = x_nchw.reshape(B, -1).astype(jnp.bfloat16)   # same flatten as torch .view(B, -1)

    # Batch tile: multiple of 8 sublanes, capped at `tb`; pad B up so the grid divides evenly.
    TB = min(tb, _round_up(B, 8))
    Bp = _round_up(B, TB)
    if Bp != B:
        x = jnp.pad(x, ((0, Bp - B), (0, 0)))

    grid = (pl.cdiv(Bp, TB),)
    # Constant index_map -> block index never changes -> DMA'd once, stays resident in VMEM.
    resident = lambda a: pl.BlockSpec(a.shape, lambda i: (0,) * a.ndim)

    out_padded = pl.pallas_call(
        mlp_kernel,
        out_shape=jax.ShapeDtypeStruct((Bp, OUTP), jnp.float32),
        grid=grid,
        in_specs=[
            pl.BlockSpec((TB, D_IN), lambda i: (i, 0)),   # x streams, double-buffered
            resident(w1p), resident(b1p),
            resident(w2p), resident(b2p),
            resident(w3p), resident(b3p),
        ],
        out_specs=pl.BlockSpec((TB, OUTP), lambda i: (i, 0)),
        compiler_params=pltpu.CompilerParams(
            dimension_semantics=("parallel",),            # shard batch across TCs on v7x
        ),
    )(x, w1p, b1p, w2p, b2p, w3p, b3p)

    return out_padded[:B, :D_OUT]


if __name__ == "__main__":
    key = jax.random.PRNGKey(0)
    k_params, k_x = jax.random.split(key)

    params = init_params(k_params)
    prepared = prepare_params(params)

    # Input consistent with 784 = 1*28*28 flatten; small batch.
    x = jax.random.normal(k_x, (2, 1, 28, 28), dtype=jnp.float32)

    out = model_2_forward(x, prepared)
    out = jax.block_until_ready(out)

    # Reference in plain f32 JAX (original unpadded params); bf16 inputs -> loose tolerance.
    w1, b1, w2, b2, w3, b3 = params
    xr = x.reshape(x.shape[0], -1)
    ref = jnp.maximum(xr @ w1 + b1, 0.0)
    ref = jnp.maximum(ref @ w2 + b2, 0.0)
    ref = ref @ w3 + b3

    assert out.shape == (2, 10)
    assert jnp.allclose(out, ref, atol=2e-2, rtol=2e-2), (out, ref)

    print("KERNEL_OK")
</pallas_src>

<mosaic_0001>
module attributes {stable_mosaic.version = 11 : i64} {
  func.func @mlp_kernel(%arg0: i32, %arg1: memref<8x784xbf16, #tpu.memory_space<vmem>>, %arg2: memref<784x128xbf16, #tpu.memory_space<vmem>>, %arg3: memref<1x128xf32, #tpu.memory_space<vmem>>, %arg4: memref<128x128xbf16, #tpu.memory_space<vmem>>, %arg5: memref<1x128xf32, #tpu.memory_space<vmem>>, %arg6: memref<128x128xbf16, #tpu.memory_space<vmem>>, %arg7: memref<1x128xf32, #tpu.memory_space<vmem>>, %arg8: memref<8x128xf32, #tpu.memory_space<vmem>>) attributes {dimension_semantics = [#tpu.dimension_semantics<parallel>], iteration_bounds = array<i64: 1>, scalar_prefetch = 0 : i64, scratch_operands = 0 : i64, tpu.core_type = #tpu.core_type<tc>, window_params = [{transform_indices = @transform_0, window_bounds = array<i64: 8, 784>}, {pipeline_mode = #tpu.pipeline_mode<synchronous>, transform_indices = @transform_1, window_bounds = array<i64: 784, 128>}, {pipeline_mode = #tpu.pipeline_mode<synchronous>, transform_indices = @transform_2, window_bounds = array<i64: 1, 128>}, {pipeline_mode = #tpu.pipeline_mode<synchronous>, transform_indices = @transform_3, window_bounds = array<i64: 128, 128>}, {pipeline_mode = #tpu.pipeline_mode<synchronous>, transform_indices = @transform_4, window_bounds = array<i64: 1, 128>}, {pipeline_mode = #tpu.pipeline_mode<synchronous>, transform_indices = @transform_5, window_bounds = array<i64: 128, 128>}, {pipeline_mode = #tpu.pipeline_mode<synchronous>, transform_indices = @transform_6, window_bounds = array<i64: 1, 128>}, {transform_indices = @transform_7, window_bounds = array<i64: 8, 128>}]} {
    %c0 = arith.constant 0 : index
    %c0_0 = arith.constant 0 : index
    %0 = vector.load %arg1[%c0, %c0_0] : memref<8x784xbf16, #tpu.memory_space<vmem>>, vector<8x784xbf16>
    %c0_1 = arith.constant 0 : index
    %c0_2 = arith.constant 0 : index
    %1 = vector.load %arg2[%c0_1, %c0_2] : memref<784x128xbf16, #tpu.memory_space<vmem>>, vector<784x128xbf16>
    %cst = arith.constant dense<0.000000e+00> : vector<8x128xf32>
    %2 = tpu.matmul %0, %1, %cst {dimension_numbers = #tpu.dot_dimension_numbers<[1], [0], [0], [1], [0, 0, 1, 1], [], []>} : vector<8x784xbf16>, vector<784x128xbf16>, vector<8x128xf32> -> vector<8x128xf32>
    %c0_3 = arith.constant 0 : index
    %c0_4 = arith.constant 0 : index
    %3 = vector.load %arg3[%c0_3, %c0_4] : memref<1x128xf32, #tpu.memory_space<vmem>>, vector<1x128xf32>
    %4 = vector.broadcast %3 : vector<1x128xf32> to vector<8x128xf32>
    %5 = arith.addf %2, %4 : vector<8x128xf32>
    %cst_5 = arith.constant 0.000000e+00 : f32
    %6 = vector.broadcast %cst_5 : f32 to vector<8x128xf32>
    %7 = arith.maximumf %5, %6 : vector<8x128xf32>
    %8 = arith.truncf %7 : vector<8x128xf32> to vector<8x128xbf16>
    %c0_6 = arith.constant 0 : index
    %c0_7 = arith.constant 0 : index
    %9 = vector.load %arg4[%c0_6, %c0_7] : memref<128x128xbf16, #tpu.memory_space<vmem>>, vector<128x128xbf16>
    %cst_8 = arith.constant dense<0.000000e+00> : vector<8x128xf32>
    %10 = tpu.matmul %8, %9, %cst_8 {dimension_numbers = #tpu.dot_dimension_numbers<[1], [0], [0], [1], [0, 0, 1, 1], [], []>} : vector<8x128xbf16>, vector<128x128xbf16>, vector<8x128xf32> -> vector<8x128xf32>
    %c0_9 = arith.constant 0 : index
    %c0_10 = arith.constant 0 : index
    %11 = vector.load %arg5[%c0_9, %c0_10] : memref<1x128xf32, #tpu.memory_space<vmem>>, vector<1x128xf32>
    %12 = vector.broadcast %11 : vector<1x128xf32> to vector<8x128xf32>
    %13 = arith.addf %10, %12 : vector<8x128xf32>
    %cst_11 = arith.constant 0.000000e+00 : f32
    %14 = vector.broadcast %cst_11 : f32 to vector<8x128xf32>
    %15 = arith.maximumf %13, %14 : vector<8x128xf32>
    %16 = arith.truncf %15 : vector<8x128xf32> to vector<8x128xbf16>
    %c0_12 = arith.constant 0 : index
    %c0_13 = arith.constant 0 : index
    %17 = vector.load %arg6[%c0_12, %c0_13] : memref<128x128xbf16, #tpu.memory_space<vmem>>, vector<128x128xbf16>
    %cst_14 = arith.constant dense<0.000000e+00> : vector<8x128xf32>
    %18 = tpu.matmul %16, %17, %cst_14 {dimension_numbers = #tpu.dot_dimension_numbers<[1], [0], [0], [1], [0, 0, 1, 1], [], []>} : vector<8x128xbf16>, vector<128x128xbf16>, vector<8x128xf32> -> vector<8x128xf32>
    %c0_15 = arith.constant 0 : index
    %c0_16 = arith.constant 0 : index
    %19 = vector.load %arg7[%c0_15, %c0_16] : memref<1x128xf32, #tpu.memory_space<vmem>>, vector<1x128xf32>
    %20 = vector.broadcast %19 : vector<1x128xf32> to vector<8x128xf32>
    %21 = arith.addf %18, %20 : vector<8x128xf32>
    %c0_17 = arith.constant 0 : index
    %c0_18 = arith.constant 0 : index
    %22 = vector.load %arg8[%c0_17, %c0_18] : memref<8x128xf32, #tpu.memory_space<vmem>>, vector<8x128xf32>
    tpu.vector_store %arg8[%c0_17, %c0_18], %21 {strides = array<i32>} : memref<8x128xf32, #tpu.memory_space<vmem>>, vector<8x128xf32>,
    return
  }
  func.func @transform_0(%arg0: i32) -> (i32, i32) {
    %c0_i32 = arith.constant 0 : i32
    %c0_i32_0 = arith.constant 0 : i32
    return %arg0, %c0_i32 : i32, i32
  }
  func.func @transform_1(%arg0: i32) -> (i32, i32) {
    %c0_i32 = arith.constant 0 : i32
    %c0_i32_0 = arith.constant 0 : i32
    %c0_i32_1 = arith.constant 0 : i32
    return %c0_i32, %c0_i32_0 : i32, i32
  }
  func.func @transform_2(%arg0: i32) -> (i32, i32) {
    %c0_i32 = arith.constant 0 : i32
    %c0_i32_0 = arith.constant 0 : i32
    %c0_i32_1 = arith.constant 0 : i32
    return %c0_i32, %c0_i32_0 : i32, i32
  }
  func.func @transform_3(%arg0: i32) -> (i32, i32) {
    %c0_i32 = arith.constant 0 : i32
    %c0_i32_0 = arith.constant 0 : i32
    %c0_i32_1 = arith.constant 0 : i32
    return %c0_i32, %c0_i32_0 : i32, i32
  }
  func.func @transform_4(%arg0: i32) -> (i32, i32) {
    %c0_i32 = arith.constant 0 : i32
    %c0_i32_0 = arith.constant 0 : i32
    %c0_i32_1 = arith.constant 0 : i32
    return %c0_i32, %c0_i32_0 : i32, i32
  }
  func.func @transform_5(%arg0: i32) -> (i32, i32) {
    %c0_i32 = arith.constant 0 : i32
    %c0_i32_0 = arith.constant 0 : i32
    %c0_i32_1 = arith.constant 0 : i32
    return %c0_i32, %c0_i32_0 : i32, i32
  }
  func.func @transform_6(%arg0: i32) -> (i32, i32) {
    %c0_i32 = arith.constant 0 : i32
    %c0_i32_0 = arith.constant 0 : i32
    %c0_i32_1 = arith.constant 0 : i32
    return %c0_i32, %c0_i32_0 : i32, i32
  }
  func.func @transform_7(%arg0: i32) -> (i32, i32) {
    %c0_i32 = arith.constant 0 : i32
    %c0_i32_0 = arith.constant 0 : i32
    return %arg0, %c0_i32 : i32, i32
  }
}

</mosaic_0001>

<bundles_post_ra>
// kernel: model_2_forward.1
= control target key start
LH: loop header
LB: loop body
LE: loop exit
PB: predicated region body
PF: predicated region fallthrough
CT: control target
= control target key end

     0   :  { %12 = vsyncpa [#allocation3], 0  ;;  %s1173_s24 = smov [#allocation2]   ;;  %s1325_s0 = inlined_call_operand.vmem [shape: bf16[8,784], index: 0, kind: input, shape index: {}]   ;;  %s1326_s1 = inlined_call_operand.hbm [shape: bf16[784,128], index: 1, kind: input, shape index: {}]   ;;  %s1327_s2 = inlined_call_operand.vmem [shape: f32[1,128], index: 2, kind: input, shape index: {}]   ;;  %s1328_s3 = inlined_call_operand.vmem [shape: bf16[128,128], index: 3, kind: input, shape index: {}]   ;;  %s1329_s4 = inlined_call_operand.vmem [shape: f32[1,128], index: 4, kind: input, shape index: {}]   ;;  %s1330_s5 = inlined_call_operand.vmem [shape: bf16[128,128], index: 5, kind: input, shape index: {}]   ;;  %s1331_s6 = inlined_call_operand.vmem [shape: f32[1,128], index: 6, kind: input, shape index: {}]   ;;  %s1332_s7 = inlined_call_operand.vmem [shape: f32[8,128], index: 7, kind: output, shape index: {}]  }
   0x1   :  { %s20_s25 = sshll.u32 %s1173_s24, 4  ;;  %s1149_s28 = scalar_lea.hbm %s1326_s1, 6272  ;;  %s21_s25 = int_to_ptr.vmem [resolvable:$true] %s20_s25 }
   0x2   :  { %p1150_p0 = scmp.ne.s32.totalorder %s1326_s1, %s1149_s28  ;;  %p1153_p1 = scmp.lt.u32.totalorder %s1149_s28, %s1326_s1 }
   0x4   :  { %p1155_p2 = pnand %p1153_p1, %p1150_p0 }
   0x6   :  { %1158 = shalt.err (!%p1155_p2)
}
   0x7   :  { %s1159_s10 = scalar_lea.vmem %s21_s25, 6272  ;;  %p1164_p4 = scmp.lt.s32.totalorder %s21_s25, %s21_s25 }
   0x8   :  { %p1160_p3 = scmp.ne.s32.totalorder %s21_s25, %s1159_s10  ;;  %p1165_p5 = scmp.lt.s32.totalorder %s1159_s10, %s1159_s10 }
   0xa   :  { %p1166_p6 = por %p1165_p5, %p1164_p4 }
   0xc   :  { %p1167_p7 = pnand %p1166_p6, %p1160_p3 }
   0xe   :  { %1170 = shalt.err (!%p1167_p7)
}
   0xf   :  { %s1174_s11 = smov 64   ;;  %s1175_s12 = smov 4  }
  0x10   :  { %26 = dma.hbm_to_vmem [thread:$0]  %s1326_s1, 6272, %s21_s25, [#allocation3], %s1174_s11, %s1174_s11, %s1175_s12  }
  0x11   :  { %1171 = dma.done.wait [#allocation3], 6272  }
  0x12   :  { %1172 = vsyncadd [#allocation3], 4294961024  ;;  %v1077_v0 = vld [vmem:[#allocation2 + $0x40] sm:$0xff]   ;;  %v1081_v4 = vld [vmem:[#allocation2 + $0x48] sm:$0xff]   ;;  %v1176_v43 = vmov 0.0   ;;  %vm1177_vm0 = vmmov 0  }
  0x13   :  { %v1078_v1 = vld [vmem:[#allocation2] sm:$0xff]   ;;  %940 = vmatprep.subr.bf16.mxu0 %v1077_v0  ;;  %v1082_v5 = vld [vmem:[#allocation2 + $0x8] sm:$0xff]   ;;  %v1085_v8 = vld [vmem:[#allocation2 + $0x50] sm:$0xff]   ;;  %vm468_vm1 = vcmask 130048  }
  0x14   :  { %v1079_v2 = vld [vmem:[#allocation2 + $0xc0] sm:$0xff]   ;;  %941 = vmatpush3.bf16.msra.mxu0 %v1078_v1  ;;  %v1083_v6 = vld [vmem:[#allocation2 + $0xc8] sm:$0xff]   ;;  %v1086_v9 = vld [vmem:[#allocation2 + $0x10] sm:$0xff]  }
  0x15   :  { %v1080_v3 = vld [vmem:[#allocation2 + $0x80] sm:$0xff]   ;;  %962 = vmatprep.subr.bf16.mxu1 %v1079_v2  ;;  %942 = vmatprep.subr.bf16.mxu0 %v1081_v4  ;;  %v1084_v7 = vld [vmem:[#allocation2 + $0x88] sm:$0xff]   ;;  %v1087_v10 = vld [vmem:[#allocation2 + $0xd0] sm:$0xff]  }
  0x16   :  { %963 = vmatpush3.bf16.msra.mxu1 %v1080_v3  ;;  %v1088_v11 = vld [vmem:[#allocation2 + $0x90] sm:$0xff]   ;;  %v1089_v12 = vld [vmem:[#allocation2 + $0x58] sm:$0xff]   ;;  %v1093_v16 = vld [vmem:[#allocation2 + $0x60] sm:$0xff]  }
  0x17   :  { %964 = vmatprep.subr.bf16.mxu1 %v1083_v6  ;;  %v1090_v13 = vld [vmem:[#allocation2 + $0x18] sm:$0xff]   ;;  %v1094_v17 = vld [vmem:[#allocation2 + $0x20] sm:$0xff]   ;;  %v1097_v20 = vld [vmem:[#allocation2 + $0x68] sm:$0xff]  }
  0x18   :  { %943 = vmatpush3.bf16.msra.mxu0 %v1082_v5  ;;  %v1091_v14 = vld [vmem:[#allocation2 + $0xd8] sm:$0xff]   ;;  %v1095_v18 = vld [vmem:[#allocation2 + $0xe0] sm:$0xff]   ;;  %v1098_v21 = vld [vmem:[#allocation2 + $0x28] sm:$0xff]  }
  0x19   :  { %944 = vmatprep.subr.bf16.mxu0 %v1085_v8  ;;  %v1092_v15 = vld [vmem:[#allocation2 + $0x98] sm:$0xff]   ;;  %v1096_v19 = vld [vmem:[#allocation2 + $0xa0] sm:$0xff]   ;;  %v1099_v22 = vld [vmem:[#allocation2 + $0xe8] sm:$0xff]  }
  0x1a   :  { %965 = vmatpush3.bf16.msra.mxu1 %v1084_v7  ;;  %v1100_v23 = vld [vmem:[#allocation2 + $0xa8] sm:$0xff]   ;;  %v1101_v24 = vld [vmem:[#allocation2 + $0x70] sm:$0xff]   ;;  %v1105_v28 = vld [vmem:[#allocation2 + $0x78] sm:$0xff]  }
  0x1b   :  { %966 = vmatprep.subr.bf16.mxu1 %v1087_v10  ;;  %v1102_v25 = vld [vmem:[#allocation2 + $0x30] sm:$0xff]   ;;  %v1106_v29 = vld [vmem:[#allocation2 + $0x38] sm:$0xff]   ;;  %v41_v31 = vld [vmem:[%s1325_s0] sm:$0xff] }
  0x1c   :  { %945 = vmatpush3.bf16.msra.mxu0 %v1086_v9  ;;  %v1103_v26 = vld [vmem:[#allocation2 + $0xf0] sm:$0xff]   ;;  %v1107_v30 = vld [vmem:[#allocation2 + $0xf8] sm:$0xff]   ;;  %v865_v32 = vcombine.low %v41_v31, %v41_v31  ;;  %v866_v33 = vcombine.high %v41_v31, %v41_v31  ;;  %v1111_v35 = vld [vmem:[#allocation2 + $0x140] sm:$0xff]  }
  0x1d   :  { %946 = vmatprep.subr.bf16.mxu0 %v1089_v12  ;;  %v1104_v27 = vld [vmem:[#allocation2 + $0xb0] sm:$0xff]   ;;  %v1110_v34 = vld [vmem:[#allocation2 + $0xb8] sm:$0xff]   ;;  %v42_v36 = vld [vmem:[%s1325_s0 + $0x8] sm:$0xff] }
  0x1e   :  { %967 = vmatpush3.bf16.msra.mxu1 %v1088_v11  ;;  %504 = vmatprep.mubr.bf16.mxu0 %v866_v33  ;;  %v867_v37 = vcombine.low %v42_v36, %v42_v36  ;;  %v868_v38 = vcombine.high %v42_v36, %v42_v36  ;;  %v1114_v39 = vld [vmem:[#allocation2 + $0x100] sm:$0xff]   ;;  %v1115_v40 = vld [vmem:[#allocation2 + $0x148] sm:$0xff]   ;;  %v1117_v42 = vld [vmem:[#allocation2 + $0x150] sm:$0xff]  }
  0x1f   :  { %968 = vmatprep.subr.bf16.mxu1 %v1091_v14  ;;  %v1116_v41 = vld [vmem:[#allocation2 + $0x108] sm:$0xff]   ;;  %v1118_v44 = vld [vmem:[#allocation2 + $0x110] sm:$0xff]   ;;  %v1119_v45 = vld [vmem:[#allocation2 + $0x158] sm:$0xff]  }
  0x20   :  { %947 = vmatpush3.bf16.msra.mxu0 %v1090_v13  ;;  %544 = vmatprep.mubr.bf16.mxu1 %v868_v38  ;;  %v1120_v46 = vld [vmem:[#allocation2 + $0x118] sm:$0xff]   ;;  %v1121_v47 = vld [vmem:[#allocation2 + $0x160] sm:$0xff]   ;;  %v1123_v49 = vld [vmem:[#allocation2 + $0x168] sm:$0xff]  }
  0x21   :  { %948 = vmatprep.subr.bf16.mxu0 %v1093_v16  ;;  %v1122_v48 = vld [vmem:[#allocation2 + $0x120] sm:$0xff]   ;;  %v43_v51 = vld [vmem:[%s1325_s0 + $0x10] sm:$0xff]  ;;  %v1124_v52 = vld [vmem:[#allocation2 + $0x128] sm:$0xff]  }
  0x22   :  { %969 = vmatpush3.bf16.msra.mxu1 %v1092_v15  ;;  %v1129_v50 = vld [vmem:[#allocation2 + $0x180] sm:$0xff]   ;;  %v870_v53 = vcombine.high %v43_v51, %v43_v51  ;;  %v1132_v54 = vld [vmem:[%s1325_s0 + $0x18] ss:$0 sps:$4 sm:$0xff]   ;;  %v1125_v55 = vld [vmem:[#allocation2 + $0x170] sm:$0xff]   ;;  %v869_v59 = vcombine.low %v43_v51, %v43_v51 }
  0x23   :  { %970 = vmatprep.subr.bf16.mxu1 %v1095_v18  ;;  %v1126_v56 = vld [vmem:[#allocation2 + $0x130] sm:$0xff]   ;;  %v1127_v57 = vld [vmem:[#allocation2 + $0x178] sm:$0xff]   ;;  %v1133_v60 = vld [vmem:[%s1328_s3] sm:$0xff]  }
  0x24   :  { %949 = vmatpush3.bf16.msra.mxu0 %v1094_v17  ;;  %v1128_v58 = vld [vmem:[#allocation2 + $0x138] sm:$0xff]   ;;  %v1134_v61 = vld [vmem:[%s1328_s3 + $0x8] sm:$0xff]   ;;  %v1135_v62 = vld [vmem:[%s1328_s3 + $0x10] sm:$0xff]  }
  0x25   :  { %950 = vmatprep.subr.bf16.mxu0 %v1097_v20  ;;  %v1136_v63 = vld [vmem:[%s1328_s3 + $0x18] sm:$0xff]   ;;  %v1137_v0 = vld [vmem:[%s1328_s3 + $0x20] sm:$0xff]   ;;  %v1138_v1 = vld [vmem:[%s1328_s3 + $0x28] sm:$0xff]  }
  0x26   :  { %971 = vmatpush3.bf16.msra.mxu1 %v1096_v19  ;;  %v1139_v2 = vld [vmem:[%s1328_s3 + $0x30] sm:$0xff]   ;;  %v1140_v3 = vld [vmem:[%s1328_s3 + $0x38] sm:$0xff]   ;;  %v1141_v4 = vld [vmem:[%s1330_s5] sm:$0xff]  }
  0x27   :  { %972 = vmatprep.subr.bf16.mxu1 %v1099_v22  ;;  %v1142_v5 = vld [vmem:[%s1330_s5 + $0x8] sm:$0xff]   ;;  %v1143_v6 = vld [vmem:[%s1330_s5 + $0x10] sm:$0xff]   ;;  %v1144_v7 = vld [vmem:[%s1330_s5 + $0x18] sm:$0xff]  }
  0x28   :  { %951 = vmatpush3.bf16.msra.mxu0 %v1098_v21  ;;  %v1145_v8 = vld [vmem:[%s1330_s5 + $0x20] sm:$0xff]   ;;  %v1146_v9 = vld [vmem:[%s1330_s5 + $0x28] sm:$0xff]   ;;  %v1147_v36 = vld [vmem:[%s1330_s5 + $0x30] sm:$0xff]  }
  0x29   :  { %952 = vmatprep.subr.bf16.mxu0 %v1101_v24  ;;  %v864_v11 = vld [vmem:[%s1327_s2] ss:$0 sm:$0xff] }
  0x2a   :  { %973 = vmatpush3.bf16.msra.mxu1 %v1100_v23  ;;  %v922_v38 = vld [vmem:[%s1329_s4] ss:$0 sm:$0xff] }
  0x2b   :  { %974 = vmatprep.subr.bf16.mxu1 %v1103_v26 }
  0x2c   :  { %953 = vmatpush3.bf16.msra.mxu0 %v1102_v25 }
  0x2d   :  { %954 = vmatprep.subr.bf16.mxu0 %v1105_v28 }
  0x2e   :  { %975 = vmatpush3.bf16.msra.mxu1 %v1104_v27 }
  0x2f   :  { %976 = vmatprep.subr.bf16.mxu1 %v1107_v30 }
  0x30   :  { %955 = vmatpush3.bf16.msra.mxu0 %v1106_v29 }
  0x31   :  { %984 = vmatprep.subr.bf16.mxu0 %v1111_v35 }
  0x32   :  { %977 = vmatpush3.bf16.msra.mxu1 %v1110_v34 }
  0x33   :  { %505 = vmatmul.mubr.bf16.vlgmr.msra.gmra.mrb[0].mxu0 %v865_v32  ;;  %1026 = vmatprep.subr.bf16.mxu1 %v1176_v43 }
  0x34   :  { %985 = vmatpush3.bf16.msra.mxu0 %v1114_v39  ;;  %584 = vmatprep.mubr.bf16.mxu0 %v870_v53 }
  0x35   :  { %545 = vmatmul.mubr.bf16.vlgmr.msra.gmra.mrb[0].mxu1 %v867_v37  ;;  %986 = vmatprep.subr.bf16.mxu0 %v1115_v40  ;;  %v1148_v37 = vld [vmem:[%s1330_s5 + $0x38] sm:$0xff]  }
  0x36   :  { %1028 = vmatprep.mubr.msk.bf16.mxu1 %vm1177_vm0, %v1176_v43  ;;  %1027 = vmatpush3.bf16.msra.mxu1 %v1129_v50 }
  0x37   :  { %1032 = vmatprep.subr.bf16.mxu1 %v1176_v43 }
  0x38   :  { %987 = vmatpush3.bf16.msra.mxu0 %v1116_v41 }
  0x39   :  { %988 = vmatprep.subr.bf16.mxu0 %v1117_v42 }
  0x3c   :  { %989 = vmatpush3.bf16.msra.mxu0 %v1118_v44 }
  0x3d   :  { %990 = vmatprep.subr.bf16.mxu0 %v1119_v45  ;;  %1029 = vmatmul.mubr.msk.bf16.vlgmr.msra.gmra.mrb[4].mxu1 %vm468_vm1, %v1132_v54 }
  0x3e   :  { %1048 = vmatprep.mubr.msk.bf16.mxu1 %vm1177_vm0, %v1176_v43  ;;  %1033 = vmatpush3.bf16.msra.mxu1 %v1133_v60 }
  0x3f   :  { %1034 = vmatprep.subr.bf16.mxu1 %v1176_v43 }
  0x40   :  { %991 = vmatpush3.bf16.msra.mxu0 %v1120_v46 }
  0x41   :  { %992 = vmatprep.subr.bf16.mxu0 %v1121_v47 }
  0x42   :  { %1035 = vmatpush3.bf16.msra.mxu1 %v1134_v61 }
  0x43   :  { %1036 = vmatprep.subr.bf16.mxu1 %v1176_v43 }
  0x44   :  { %993 = vmatpush3.bf16.msra.mxu0 %v1122_v48 }
  0x45   :  { %994 = vmatprep.subr.bf16.mxu0 %v1123_v49 }
  0x46   :  { %1037 = vmatpush3.bf16.msra.mxu1 %v1135_v62 }
  0x47   :  { %1038 = vmatprep.subr.bf16.mxu1 %v1176_v43 }
  0x48   :  { %995 = vmatpush3.bf16.msra.mxu0 %v1124_v52 }
  0x49   :  { %996 = vmatprep.subr.bf16.mxu0 %v1125_v55 }
  0x4a   :  { %1039 = vmatpush3.bf16.msra.mxu1 %v1136_v63 }
  0x4b   :  { %1040 = vmatprep.subr.bf16.mxu1 %v1176_v43 }
  0x4c   :  { %997 = vmatpush3.bf16.msra.mxu0 %v1126_v56 }
  0x4d   :  { %998 = vmatprep.subr.bf16.mxu0 %v1127_v57 }
  0x4e   :  { %1041 = vmatpush3.bf16.msra.mxu1 %v1137_v0 }
  0x4f   :  { %1042 = vmatprep.subr.bf16.mxu1 %v1176_v43 }
  0x50   :  { %999 = vmatpush3.bf16.msra.mxu0 %v1128_v58 }
  0x51   :  { %1052 = vmatprep.subr.bf16.mxu0 %v1176_v43 }
  0x52   :  { %1043 = vmatpush3.bf16.msra.mxu1 %v1138_v1 }
  0x53   :  { %585 = vmatmul.mubr.bf16.vlgmr.msra.gmra.mrb[4].mxu0 %v869_v59  ;;  %1044 = vmatprep.subr.bf16.mxu1 %v1176_v43 }
  0x54   :  { %1068 = vmatprep.mubr.msk.bf16.mxu0 %vm1177_vm0, %v1176_v43  ;;  %1053 = vmatpush3.bf16.msra.mxu0 %v1141_v4 }
  0x55   :  { %1054 = vmatprep.subr.bf16.mxu0 %v1176_v43 }
  0x56   :  { %1045 = vmatpush3.bf16.msra.mxu1 %v1139_v2 }
  0x57   :  { %1046 = vmatprep.subr.bf16.mxu1 %v1176_v43 }
  0x58   :  { %1055 = vmatpush3.bf16.msra.mxu0 %v1142_v5 }
  0x59   :  { %1056 = vmatprep.subr.bf16.mxu0 %v1176_v43 }
  0x5a   :  { %1047 = vmatpush3.bf16.msra.mxu1 %v1140_v3 }
  0x5c   :  { %1057 = vmatpush3.bf16.msra.mxu0 %v1143_v6 }
  0x5d   :  { %1058 = vmatprep.subr.bf16.mxu0 %v1176_v43 }
  0x60   :  { %1059 = vmatpush3.bf16.msra.mxu0 %v1144_v7 }
  0x61   :  { %1060 = vmatprep.subr.bf16.mxu0 %v1176_v43 }
  0x64   :  { %1061 = vmatpush3.bf16.msra.mxu0 %v1145_v8 }
  0x65   :  { %1062 = vmatprep.subr.bf16.mxu0 %v1176_v43 }
  0x68   :  { %1063 = vmatpush3.bf16.msra.mxu0 %v1146_v9 }
  0x69   :  { %1064 = vmatprep.subr.bf16.mxu0 %v1176_v43 }
  0x6c   :  { %1065 = vmatpush3.bf16.msra.mxu0 %v1147_v36 }
  0x6d   :  { %1066 = vmatprep.subr.bf16.mxu0 %v1176_v43  ;;  %v931_v43 = vld [vmem:[%s1331_s6] ss:$0 sm:$0xff] }
  0x70   :  { %1067 = vmatpush3.bf16.msra.mxu0 %v1148_v37 }
 0x106   :  { %v956_v10 = vpop.f32.mrb[0].mxu0 }
 0x107   :  { %v957_v12 = vpop.f32.mrb[1].mxu0 }
 0x108   :  { %v958_v13 = vadd.f32 %v957_v12, %v956_v10  ;;  %v959_v14 = vpop.f32.mrb[2].mxu0  ;;  %v978_v15 = vpop.f32.mrb[0].mxu1 }
 0x109   :  { %v960_v16 = vpop.f32.mrb[3].mxu0  ;;  %v979_v17 = vpop.f32.mrb[1].mxu1 }
 0x10a   :  { %v507_v18 = vadd.f32 %v958_v13, %v864_v11  ;;  %v980_v19 = vadd.f32 %v979_v17, %v978_v15  ;;  %v981_v20 = vpop.f32.mrb[2].mxu1 }
 0x10b   :  { %v982_v21 = vpop.f32.mrb[3].mxu1 }
 0x10c   :  { %v547_v22 = vadd.f32 %v980_v19, %v507_v18 }
 0x110   :  { %v626_v23 = vpop.f32.mrb[4].mxu1 }
 0x111   :  { %v1030_v24 = vpop.f32.mrb[5].mxu1 }
 0x112   :  { %v629_v25 = vpop.f32.mrb[6].mxu1 }
 0x113   :  { %v1031_v26 = vpop.f32.mrb[7].mxu1 }
 0x126   :  { %v1000_v27 = vpop.f32.mrb[4].mxu0 }
 0x127   :  { %v1001_v28 = vpop.f32.mrb[5].mxu0 }
 0x128   :  { %v1002_v29 = vadd.f32 %v1001_v28, %v1000_v27  ;;  %v1003_v30 = vpop.f32.mrb[6].mxu0 }
 0x129   :  { %v1004_v31 = vpop.f32.mrb[7].mxu0 }
 0x12a   :  { %v587_v32 = vadd.f32 %v1002_v29, %v547_v22 }
 0x12c   :  { %v627_v33 = vadd.f32 %v626_v23, %v587_v32 }
 0x12e   :  { %v632_v34 = vmax.f32 %v627_v33, 0.0 }
 0x130   :  { %v633_v35 = vpack.c.bf16 %v632_v34, %v632_v34 }
 0x132   :  { %1049 = vmatmul.mubr.bf16.vlgmr.msra.gmra.mrb[8].mxu1 %v633_v35 }
 0x205   :  { %v739_v39 = vpop.f32.mrb[8].mxu1 }
 0x206   :  { %v740_v40 = vadd.f32 %v922_v38, %v739_v39  ;;  %v1050_v41 = vpop.f32.mrb[9].mxu1 }
 0x207   :  { %v742_v42 = vpop.f32.mrb[10].mxu1 }
 0x208   :  { %v745_v44 = vmax.f32 %v740_v40, 0.0  ;;  %v1051_v45 = vpop.f32.mrb[11].mxu1 }
 0x20a   :  { %v746_v46 = vpack.c.bf16 %v745_v44, %v745_v44 }
 0x20c   :  { %1069 = vmatmul.mubr.bf16.vlgmr.msra.gmra.mrb[8].mxu0 %v746_v46 }
 0x2df   :  { %v852_v47 = vpop.f32.mrb[8].mxu0 }
 0x2e0   :  { %v853_v48 = vadd.f32 %v931_v43, %v852_v47  ;;  %v1070_v49 = vpop.f32.mrb[9].mxu0 }
 0x2e1   :  { %v855_v50 = vpop.f32.mrb[10].mxu0 }
 0x2e2   :  { %858 = vst [vmem:[%s1332_s7] sm:$0xff] %v853_v48  ;;  %v1071_v51 = vpop.f32.mrb[11].mxu0 }
 0x2e3   :  { %863 = vsyncpa [#allocation3], 1 }

</bundles_post_ra>
